<compile_context>
chip_gen: v7x
topology: tpu7x:2x2x1
jax: 0.10.0
libtpu: 0.0.40
codegen_flags: <defaults>
</compile_context>

<pallas_src>
import functools

import jax
import jax.numpy as jnp
from jax.experimental import pallas as pl
from jax.experimental.pallas import tpu as pltpu

_LANE = 128


def _cdiv(a, b):
    return -(-a // b)


def _round_up(a, b):
    return _cdiv(a, b) * b


def asymmetric_linear_quantization_params(num_bits, sat_min, sat_max, signed=False):
    # Mirrors distiller's helper for the (sat_min=0, unsigned) case used here.
    n = 2 ** num_bits - 1
    diff = max(sat_max - sat_min, 1e-8)
    scale = n / diff
    zero_point = round(scale * sat_min)
    if signed:
        zero_point += 2 ** (num_bits - 1)
    return float(scale), float(zero_point)


def _clipped_quant_kernel(x_ref, o_ref, *, clip_val, scale, dequantize):
    # Upcast to f32: keeps round(x*scale) exact for bf16/fp16 activations at
    # higher num_bits; free in this HBM-bound regime.
    x = x_ref[...].astype(jnp.float32)
    x = jnp.clip(x, 0.0, clip_val)                 # clamp(input, 0, clip_val)
    q = jnp.round(x * scale)                       # linear_quantize (zp == 0)
    if dequantize:
        # Actual divide (not reciprocal multiply): bit-exact parity with the
        # reference; the EUP/VPU have plenty of slack here.
        q = q / scale
    o_ref[...] = q.astype(o_ref.dtype)


def _clipped_quant_jnp(x, *, clip_val, scale, dequantize):
    y = jnp.clip(x.astype(jnp.float32), 0.0, clip_val)
    q = jnp.round(y * scale)
    if dequantize:
        q = q / scale
    return q.astype(x.dtype)


def _pallas_quant_2d(x2d, *, clip_val, scale, dequantize, block_bytes, donate_input):
    rows, lanes = x2d.shape
    assert lanes == _LANE
    dtype = x2d.dtype
    itemsize = jnp.dtype(dtype).itemsize
    # Sublane packing multiple for this dtype: 8 (f32) / 16 (bf16) / 32 (int8).
    sub = max(8, 32 // itemsize)

    # ~4 MiB per input block by default; with in+out each double-buffered the
    # pipeline footprint is ~4x block_bytes (covered by vmem_limit below).
    budget_rows = max(sub, (block_bytes // (_LANE * itemsize)) // sub * sub)

    # Force >= 2 grid steps (v7x shards the "parallel" axis across its 2 TCs)
    # and prefer an even step count to avoid a (k+1)/k core imbalance.
    steps = _cdiv(rows, budget_rows)
    if steps % 2:
        steps += 1
    steps = max(steps, 2)
    block_rows = min(budget_rows, _round_up(_cdiv(rows, steps), sub))
    if block_rows >= rows:
        block_rows = rows  # full-extent block (always satisfies the (8,128) rule)
    grid = (_cdiv(rows, block_rows),)

    kernel = functools.partial(
        _clipped_quant_kernel,
        clip_val=float(clip_val),
        scale=float(scale),
        dequantize=dequantize,
    )

    extra = {}
    if donate_input:
        # Inference-only: alias the input buffer to the output to cut peak HBM
        # footprint.  Caller must not reuse x afterwards (e.g. STE backward).
        extra["input_output_aliases"] = {0: 0}

    return pl.pallas_call(
        kernel,
        out_shape=jax.ShapeDtypeStruct((rows, _LANE), dtype),
        grid_spec=pltpu.PrefetchScalarGridSpec(
            num_scalar_prefetch=0,
            grid=grid,
            in_specs=[pl.BlockSpec((block_rows, _LANE), lambda i: (i, 0))],
            out_specs=pl.BlockSpec((block_rows, _LANE), lambda i: (i, 0)),
        ),
        compiler_params=pltpu.CompilerParams(
            dimension_semantics=("parallel",),
            # 2 x in + 2 x out double-buffered ~4 MiB blocks ~= 16 MiB; raise
            # past v5e's 16 MiB scoped default, still < v7x's 64 MiB physical.
            vmem_limit_bytes=32 << 20,
        ),
        **extra,
    )(x2d)


def clipped_linear_quantization(x, num_bits, clip_val, dequantize=True, *,
                                block_bytes=4 << 20,
                                min_pallas_bytes=1 << 20,
                                force_pallas=False,
                                donate_input=False):
    """Applies ClippedLinearQuantization.forward to a float tensor (any shape)."""
    scale, zero_point = asymmetric_linear_quantization_params(
        num_bits, 0.0, clip_val, signed=False
    )
    # sat_min=0, unsigned  =>  zero_point is always exactly 0.
    assert zero_point == 0.0

    orig_shape = x.shape
    itemsize = jnp.dtype(x.dtype).itemsize

    # Small inputs: fixed pallas_call / DMA-pipeline setup dominates; plain XLA
    # fuses the elementwise chain for free.
    if not force_pallas and x.size * itemsize < min_pallas_bytes:
        return _clipped_quant_jnp(x, clip_val=clip_val, scale=scale,
                                  dequantize=dequantize)

    flat = x.reshape(-1)
    n = flat.shape[0]
    rem = n % _LANE
    main_n = n - rem

    pieces = []
    if main_n:
        rows = main_n // _LANE
        x2d = (flat.reshape(rows, _LANE) if rem == 0
               else flat[:main_n].reshape(rows, _LANE))
        out2d = _pallas_quant_2d(x2d, clip_val=clip_val, scale=scale,
                                 dequantize=dequantize, block_bytes=block_bytes,
                                 donate_input=donate_input)
        if rem == 0:
            # Common case (activation numel % 128 == 0): no pad, no slice.
            return out2d.reshape(orig_shape)
        pieces.append(out2d.reshape(-1))
    if rem:
        # TODO(synk): the tail + concat still costs one HBM round trip for
        # ragged inputs; a manual-DMA kernel over the raw flat HBM ref would
        # remove it entirely.
        pieces.append(_clipped_quant_jnp(flat[main_n:], clip_val=clip_val,
                                         scale=scale, dequantize=dequantize))
    out_flat = pieces[0] if len(pieces) == 1 else jnp.concatenate(pieces)
    return out_flat.reshape(orig_shape)


def _reference(x, num_bits, clip_val, dequantize=True):
    scale, zero_point = asymmetric_linear_quantization_params(
        num_bits, 0.0, clip_val, signed=False
    )
    y = jnp.clip(x, 0.0, clip_val)
    q = jnp.round(scale * y - zero_point)
    if dequantize:
        q = (q + zero_point) / scale
    return q.astype(x.dtype)


if __name__ == "__main__":
    # Module params (deterministic, from __init__ signature).
    num_bits = 4
    clip_val = 6.0  # ReLU6-style clipping
    dequantize = True

    key = jax.random.PRNGKey(0)
    k1, k2 = jax.random.split(key)

    # NCHW activation, small shape (numel = 2048, multiple of 128).
    # force_pallas=True so the Pallas path is actually exercised despite the
    # small-input bypass.
    x = jax.random.uniform(k1, (2, 4, 16, 16), dtype=jnp.float32,
                           minval=-2.0, maxval=8.0)
    out = clipped_linear_quantization(x, num_bits, clip_val, dequantize,
                                      force_pallas=True)
    out = jax.block_until_ready(out)
    ref = _reference(x, num_bits, clip_val, dequantize)
    assert out.shape == x.shape and out.dtype == x.dtype
    assert jnp.allclose(out, ref, atol=1e-6, rtol=1e-6), "mismatch vs reference"

    # Ragged numel (3*5*7*11 = 1155 = 9*128 + 3) exercises the jnp tail path.
    xr = jax.random.uniform(k2, (3, 5, 7, 11), dtype=jnp.float32,
                            minval=-2.0, maxval=8.0)
    outr = jax.block_until_ready(
        clipped_linear_quantization(xr, num_bits, clip_val, dequantize,
                                    force_pallas=True))
    refr = _reference(xr, num_bits, clip_val, dequantize)
    assert outr.shape == xr.shape and outr.dtype == xr.dtype
    assert jnp.allclose(outr, refr, atol=1e-6, rtol=1e-6), "ragged mismatch"

    print("KERNEL_OK")
</pallas_src>

<mosaic_0001>
module attributes {stable_mosaic.version = 11 : i64} {
  func.func @_clipped_quant_kernel(%arg0: i32, %arg1: memref<8x128xf32, #tpu.memory_space<vmem>>, %arg2: memref<8x128xf32, #tpu.memory_space<vmem>>) attributes {dimension_semantics = [#tpu.dimension_semantics<parallel>], iteration_bounds = array<i64: 2>, scalar_prefetch = 0 : i64, scratch_operands = 0 : i64, tpu.core_type = #tpu.core_type<tc>, window_params = [{transform_indices = @transform_0, window_bounds = array<i64: 8, 128>}, {transform_indices = @transform_1, window_bounds = array<i64: 8, 128>}]} {
    %c0 = arith.constant 0 : index
    %c0_0 = arith.constant 0 : index
    %0 = vector.load %arg1[%c0, %c0_0] : memref<8x128xf32, #tpu.memory_space<vmem>>, vector<8x128xf32>
    %cst = arith.constant 0.000000e+00 : f32
    %cst_1 = arith.constant 6.000000e+00 : f32
    %1 = vector.broadcast %cst : f32 to vector<8x128xf32>
    %2 = arith.maximumf %1, %0 : vector<8x128xf32>
    %3 = vector.broadcast %cst_1 : f32 to vector<8x128xf32>
    %4 = arith.minimumf %3, %2 : vector<8x128xf32>
    %cst_2 = arith.constant 2.500000e+00 : f32
    %5 = vector.broadcast %cst_2 : f32 to vector<8x128xf32>
    %6 = arith.mulf %4, %5 : vector<8x128xf32>
    %7 = math.roundeven %6 : vector<8x128xf32>
    %cst_3 = arith.constant 2.500000e+00 : f32
    %8 = vector.broadcast %cst_3 : f32 to vector<8x128xf32>
    %9 = arith.divf %7, %8 : vector<8x128xf32>
    %c0_4 = arith.constant 0 : index
    %c0_5 = arith.constant 0 : index
    %10 = vector.load %arg2[%c0_4, %c0_5] : memref<8x128xf32, #tpu.memory_space<vmem>>, vector<8x128xf32>
    tpu.vector_store %arg2[%c0_4, %c0_5], %9 {strides = array<i32>} : memref<8x128xf32, #tpu.memory_space<vmem>>, vector<8x128xf32>,
    return
  }
  func.func @transform_0(%arg0: i32) -> (i32, i32) {
    %c0_i32 = arith.constant 0 : i32
    %c0_i32_0 = arith.constant 0 : i32
    return %arg0, %c0_i32 : i32, i32
  }
  func.func @transform_1(%arg0: i32) -> (i32, i32) {
    %c0_i32 = arith.constant 0 : i32
    %c0_i32_0 = arith.constant 0 : i32
    return %arg0, %c0_i32 : i32, i32
  }
}

</mosaic_0001>

<bundles_post_ra>
// kernel: tpu_custom_call.1
= control target key start
LH: loop header
LB: loop body
LE: loop exit
PB: predicated region body
PF: predicated region fallthrough
CT: control target
= control target key end

     0   :  { %6 = vsyncpa [#allocation3], 0  ;;  %s554_s0 = inlined_call_operand.hbm [shape: f32[16,128], index: 0, kind: input, shape index: {}]   ;;  %s555_s1 = inlined_call_operand.hbm [shape: f32[16,128], index: 1, kind: output, shape index: {}]  }
   0x1   :  { %8 = vsyncpa [#allocation3 + $0x1], 0 }
   0x2   :  { %9 = vsyncpa [#allocation4], 0 }
   0x3   :  { %11 = vsyncpa [#allocation4 + $0x1], 0  ;;  %s393_s6 = smov 0   ;;  %s395_s7 = smov 0  }
   0x4   :  { %s397_s8 = smov 0   ;;  %s399_s9 = smov 0  }
   0x5 LB: > { %s414_s10 = sadd.s32 4294967295, %s379_s9   ;;  %s224_s11 = sadd.s32 4294967294, %s379_s9   ;;  %s379_s9 = sphi %s399_s9, %s570_s9   ;;  %s375_s8 = sphi %s397_s8, %s569_s8   ;;  %s371_s7 = sphi %s395_s7, %s568_s7   ;;  %s367_s6 = sphi %s393_s6, %s567_s6  }
   0x6   : > { %s418_s12 = sadd.s32 1, %s379_s9   ;;  %s24_s13 = sadd.s32 1, %s375_s8 }
   0x7   : > { %s21_s14 = ssub.s32 %s379_s9, %s418_s12  ;;  %p31_p0 = scmp.ne.s32.totalorder %s375_s8, %s371_s7 }
   0x8   : > { %p22_p1 = scmp.eq.s32.totalorder %s21_s14, 0  ;;  %p32_p2 = scmp.eq.s32.totalorder %s379_s9, 0 }
   0x9   : > { %p37_p3 = scmp.ne.s32.totalorder %s371_s7, %s367_s6  ;;  %p38_p4 = scmp.eq.s32.totalorder %s414_s10, 0 }
   0xa   : > { %s430_s15 = scalar_select %p22_p1, %s375_s8, %s24_s13  }
   0xb   : > { %p432_p5 = por %p32_p2, %p31_p0  ;;  %p436_p6 = por %p38_p4, %p37_p3 }
   0xc   : > { %p61_p7 = scmp.eq.s32.totalorder %s414_s10, 1  ;;  %p67_p8 = scmp.eq.s32.totalorder %s224_s11, 1 }
   0xd   : > { %p249_p10 = scmp.lt.s32.totalorder %s379_s9, 2  ;;  %s87_s20 = sand.u32 1, %s375_s8  }
   0xe   : > { %p443_p11 = por %p61_p7, %p31_p0  ;;  %p447_p12 = por %p67_p8, %p37_p3 }
   0xf   : > { %s228_s21 = sshll.u32 %s379_s9, 7  ;;  %s227_s22 = sshll.u32 %s87_s20, 3 }
  0x10   : > { %s559_s18 = scalar_select %p443_p11, 1, 0 }
  0x11   : > { %s560_s19 = scalar_select %p447_p12, 1, 0 }
  0x12   : > { %s456_s25 = scalar_lea.hbm %s554_s0, %s228_s21  ;;  %s91_s26 = scalar_lea.vmem [#allocation2], %s227_s22 }
  0x13   : > { %s98_s27 = sshll.u32 %s91_s26, 4  ;;  %p460_p13 = pnand %p249_p10, %p432_p5  ;;  %s464_s27 = int_to_ptr.vmem [resolvable:$true] %s98_s27 }
  0x14   : > { %s88_s29 = scalar_lea.sflag [#allocation3], %s87_s20  ;;  %s283_s30 = scalar_lea.hbm %s456_s25, 128 }
  0x15   : > { %p284_p2 = scmp.ne.s32.totalorder %s456_s25, %s283_s30  ;;  %p285_p3 = pneg %p460_p13 }
  0x16   : > { %s288_s4 = scalar_lea.hbm %s554_s0, 256  ;;  %p289_p5 = scmp.lt.u32.totalorder %s456_s25, %s554_s0 }
  0x17   : > { %p286_p4 = pnand %p285_p3, %p284_p2  ;;  %p290_p8 = scmp.lt.u32.totalorder %s288_s4, %s283_s30 }
  0x18   : > { %p292_p9 = scmp.lt.u32.totalorder %s283_s30, %s456_s25 }
  0x19   : > { %p287_p7 = pneg %p286_p4  ;;  %p291_p10 = por %p290_p8, %p289_p5 }
  0x1b   : > { %p293_p0 = por %p292_p9, %p291_p10 }
  0x1d   : > { %p294_p1 = pnand %p293_p0, %p287_p7 }
  0x1f   : > { %297 = shalt.err (!%p294_p1)
}
  0x20   : > { %s298_s13 = scalar_lea.vmem %s464_s27, 128  ;;  %s381_s14 = smov [#allocation2]  }
  0x21   : > { %p299_p2 = scmp.ne.s32.totalorder %s464_s27, %s298_s13  ;;  %s303_s16 = sshll.u32 %s381_s14, 4  ;;  %s304_s16 = int_to_ptr.vmem [resolvable:$false] %s303_s16 }
  0x22   : > { %s305_s20 = scalar_lea.vmem %s304_s16, 256  ;;  %p306_p11 = scmp.lt.s32.totalorder %s464_s27, %s304_s16 }
  0x23   : > { %p301_p4 = pnand %p299_p2, %p285_p3  ;;  %p307_p5 = scmp.lt.s32.totalorder %s305_s20, %s298_s13 }
  0x25   : > { %p302_p12 = pneg %p301_p4  ;;  %p308_p8 = por %p307_p5, %p306_p11 }
  0x27   : > { %p309_p9 = pnand %p308_p8, %p302_p12 }
  0x29   : > { %312 = shalt.err (!%p309_p9)
}
  0x2a   : > { %244 = dma.hbm_to_vmem [thread:$0]  (!%p460_p13), %s456_s25, 128, %s464_s27, %s88_s29  }
  0x2b   : > { %p562_p0 = scmp.lt.s32.totalorder %s379_s9, 3  ;;  %p563_p1 = scmp.ge.s32.totalorder %s379_s9, 1 }
  0x2d   : > { %p104_p3 = pnand %p563_p1, %p562_p0 }
  0x2e   : > { %s498_s21 = sand.u32 (!%p104_p3), 1, %s371_s7  }
  0x2f   : > { %107 = sbr.rel (%p104_p3) target bundleno = 81 (0x51), region = 24  ;;  %s230_s22 = sshll.u32 (!%p104_p3), %s498_s21, 3 }
  0x30   : > { %s110_s23 = scalar_lea.sflag (!%p104_p3), [#allocation3], %s498_s21  ;;  %s113_s24 = scalar_lea.vmem (!%p104_p3), [#allocation2], %s230_s22 }
  0x36   : > { %358 = dma.done.wait (%p436_p6), %s110_s23, 128  }
  0x37   : > { %360 = vsyncadd (%p436_p6), %s110_s23, 4294967168  ;;  %v132_v0 = vld [vmem:[%s113_s24] sm:$0xff]  ;;  %s131_s25 = scalar_lea.vmem [#allocation5], %s230_s22  ;;  %s233_s27 = sshll.u32 %s414_s10, 7 }
  0x38   : > { %v133_v1 = vmax.f32 %v132_v0, 0.0  ;;  %s154_s26 = sshll.u32 %s131_s25, 4  ;;  %s512_s17 = scalar_lea.hbm %s555_s1, %s233_s27  ;;  %s507_s26 = int_to_ptr.vmem [resolvable:$true] %s154_s26 }
  0x39   : > { %s141_s30 = scalar_lea.sflag [#allocation4], %s498_s21  ;;  %s313_s2 = scalar_lea.vmem %s507_s26, 128 }
  0x3a   : > { %v134_v2 = vmin.f32 %v133_v1, 6.0  ;;  %p314_p6 = scmp.ne.s32.totalorder %s507_s26, %s313_s2  ;;  %p564_p11 = scmp.ne.s32.totalorder %s559_s18, 0 }
  0x3b   : > { %s382_s10 = smov [#allocation5]  }
  0x3c   : > { %v135_v3 = vmul.f32 2.5, %v134_v2  ;;  %p315_p12 = pnand %p314_p6, %p564_p11  ;;  %s317_s3 = sshll.u32 %s382_s10, 4  ;;  %s318_s3 = int_to_ptr.vmem [resolvable:$false] %s317_s3 }
  0x3d   : > { %s319_s4 = scalar_lea.vmem %s318_s3, 256  ;;  %p320_p7 = scmp.lt.s32.totalorder %s507_s26, %s318_s3 }
  0x3e   : > { %v236_v4 = vround.rtne.f32 %v135_v3  ;;  %p316_p13 = pneg %p315_p12  ;;  %p321_p10 = scmp.lt.s32.totalorder %s319_s4, %s313_s2 }
  0x40   : > { %v138_v5 = vmul.f32 0.4, %v236_v4  ;;  %p322_p2 = por %p321_p10, %p320_p7 }
  0x42   : > { %139 = vst [vmem:[%s131_s25] sm:$0xff] %v138_v5  ;;  %p323_p4 = pnand %p322_p2, %p316_p13 }
  0x44   : > { %326 = shalt.err (!%p323_p4)
}
  0x45   : > { %s327_s5 = scalar_lea.hbm %s512_s17, 128  ;;  %s331_s14 = scalar_lea.hbm %s555_s1, 256 }
  0x46   : > { %p328_p5 = scmp.ne.s32.totalorder %s512_s17, %s327_s5  ;;  %p332_p0 = scmp.lt.u32.totalorder %s512_s17, %s555_s1 }
  0x47   : > { %p333_p1 = scmp.lt.u32.totalorder %s331_s14, %s327_s5  ;;  %p335_p6 = scmp.lt.u32.totalorder %s327_s5, %s512_s17 }
  0x48   : > { %p329_p8 = pnand %p328_p5, %p564_p11 }
  0x49   : > { %p334_p3 = por %p333_p1, %p332_p0 }
  0x4a   : > { %p330_p9 = pneg %p329_p8 }
  0x4b   : > { %p336_p12 = por %p335_p6, %p334_p3 }
  0x4d   : > { %p337_p13 = pnand %p336_p12, %p330_p9 }
  0x4f   : > { %340 = shalt.err (!%p337_p13)
}
  0x50   : > { %239 = dma.vmem_to_hbm [thread:$0]  (%p564_p11), %s507_s26, 128, %s512_s17, %s141_s30  }
  0x51 PF: > { %s166_s21 = sand.u32 1, %s367_s6   ;;  %p565_p7 = scmp.ne.s32.totalorder %s560_s19, 0 }
  0x52   : > { %p566_p10 = scmp.ge.s32.totalorder %s379_s9, 2  ;;  %s167_s22 = scalar_lea.sflag [#allocation4], %s166_s21 }
  0x54   : > { %p246_p2 = pnand %p566_p10, %p565_p7 }
  0x56   : > { %362 = dma.done.wait (!%p246_p2), %s167_s22, 128  }
  0x57   : > { %364 = vsyncadd (!%p246_p2), %s167_s22, 4294967168  ;;  %p14_p4 = scmp.ge.s32.totalorder %s418_s12, 4   ;;  %s567_s6 = smov %s371_s7 }
  0x58   : > { %s568_s7 = smov %s375_s8  ;;  %s569_s8 = smov %s430_s15 }
  0x59   : > { %s570_s9 = smov %s418_s12  ;;  %16 = sbr.rel (!%p14_p4) target bundleno = 5 (0x5), region = 69 }
  0x60   :  { %172 = vsyncpa [#allocation3], 1 }
  0x61   :  { %174 = vsyncpa [#allocation3 + $0x1], 1 }
  0x62   :  { %175 = vsyncpa [#allocation4], 1 }
  0x63   :  { %177 = vsyncpa [#allocation4 + $0x1], 1 }

</bundles_post_ra>
